<compile_context>
chip_gen: v6e
topology: v6e:2x2x1
jax: 0.10.0
libtpu: 0.0.40
codegen_flags: <defaults>
</compile_context>

<pallas_src>
import jax
import jax.numpy as jnp
from jax.experimental import pallas as pl
from jax.experimental.pallas import tpu as pltpu


def _round_up(x, m):
    return ((x + m - 1) // m) * m


def linear_kernel(x_ref, w_ref, b_ref, o_ref, acc_ref):
    # x_ref: (tm, tk), w_ref: (tk, tn), b_ref: (1, tn), o_ref: (tm, tn), acc_ref: (tm, tn) f32
    k = pl.program_id(2)

    @pl.when(k == 0)
    def _():
        acc_ref[...] = jnp.zeros_like(acc_ref)

    acc_ref[...] += jnp.dot(
        x_ref[...], w_ref[...], preferred_element_type=jnp.float32
    )

    @pl.when(k == pl.num_programs(2) - 1)
    def _():
        # Bias added exactly once, in f32, then cast to the output dtype.
        o_ref[...] = (acc_ref[...] + b_ref[...].astype(jnp.float32)).astype(o_ref.dtype)


def linear(x, weights, bias, *, tm=256, tn=256, tk=512):
    """y = x @ weights + bias. x may have leading batch dims (matmul broadcasts them)."""
    orig_shape = x.shape
    K = orig_shape[-1]
    K2, N = weights.shape
    assert K == K2, "reduction dims must match"

    x2d = x.reshape(-1, K)
    M = x2d.shape[0]

    # Clamp tile sizes to the (aligned) problem size:
    #   tm: multiple of 8 (sublane), tn: multiple of 128 (lane-dense stores),
    #   tk: multiple of 128 (MXU-aligned reduction tiles).
    tm = min(tm, _round_up(M, 8))
    tn = min(tn, _round_up(N, 128))
    tk = min(tk, _round_up(K, 128))

    Mp, Kp, Np = _round_up(M, tm), _round_up(K, tk), _round_up(N, tn)

    # Zero-pad so every block read is in-bounds (zeros do not affect the matmul / bias add).
    xp = x2d if (Mp == M and Kp == K) else jnp.pad(x2d, ((0, Mp - M), (0, Kp - K)))
    wp = weights if (Kp == K and Np == N) else jnp.pad(weights, ((0, Kp - K), (0, Np - N)))
    bp = bias if Np == N else jnp.pad(bias, (0, Np - N))
    b2d = bp.reshape(1, Np)

    grid = (Mp // tm, Np // tn, Kp // tk)

    itemsize = jnp.dtype(xp.dtype).itemsize
    cost = pl.CostEstimate(
        flops=2 * Mp * Kp * Np,
        transcendentals=0,
        bytes_accessed=(Mp * Kp + Kp * Np + Mp * Np + Np) * itemsize,
    )

    out = pl.pallas_call(
        linear_kernel,
        out_shape=jax.ShapeDtypeStruct((Mp, Np), x.dtype),
        grid_spec=pltpu.PrefetchScalarGridSpec(
            num_scalar_prefetch=0,
            grid=grid,
            in_specs=[
                pl.BlockSpec((tm, tk), lambda i, j, k: (i, k)),  # x tile along (M, K)
                pl.BlockSpec((tk, tn), lambda i, j, k: (k, j)),  # streamed weight tile
                pl.BlockSpec((1, tn), lambda i, j, k: (0, j)),   # bias tile (per N block)
            ],
            out_specs=pl.BlockSpec((tm, tn), lambda i, j, k: (i, j)),
            scratch_shapes=[pltpu.VMEM((tm, tn), jnp.float32)],
        ),
        compiler_params=pltpu.CompilerParams(
            dimension_semantics=("parallel", "parallel", "arbitrary"),
            vmem_limit_bytes=32 * 1024 * 1024,
        ),
        cost_estimate=cost,
    )(xp, wp, b2d)

    out = out[:M, :N]
    return out.reshape(*orig_shape[:-1], N)
    # TODO(synk): optionally cast x/weights to bf16 before the MXU on v6e/v7x for ~2x matmul
    # throughput; kept f32 here to exactly preserve the reference module's numerics.


if __name__ == "__main__":
    key = jax.random.PRNGKey(0)
    kx, kw, kb = jax.random.split(key, 3)

    # Small shapes implied by the forward: x [M, K], weights [K, N], bias [N]
    M, K, N = 16, 32, 64
    x = jax.random.normal(kx, (M, K), dtype=jnp.float32)
    weights = jax.random.normal(kw, (K, N), dtype=jnp.float32) * 0.1
    bias = jax.random.normal(kb, (N,), dtype=jnp.float32)

    y = linear(x, weights, bias)
    y = jax.block_until_ready(y)

    # Reference check in plain JAX (same semantics as torch.matmul(x, W) + b)
    y_ref = x @ weights + bias
    assert y.shape == (M, N)
    assert jnp.allclose(y, y_ref, atol=1e-5, rtol=1e-5), "mismatch vs reference"

    print("KERNEL_OK")
</pallas_src>

<mosaic_0001>
module attributes {stable_mosaic.version = 11 : i64} {
  func.func @linear_kernel(%arg0: i32, %arg1: i32, %arg2: i32, %arg3: memref<16x128xf32, #tpu.memory_space<vmem>>, %arg4: memref<128x128xf32, #tpu.memory_space<vmem>>, %arg5: memref<1x128xf32, #tpu.memory_space<vmem>>, %arg6: memref<16x128xf32, #tpu.memory_space<vmem>>, %arg7: memref<16x128xf32, #tpu.memory_space<vmem>>) attributes {dimension_semantics = [#tpu.dimension_semantics<parallel>, #tpu.dimension_semantics<parallel>, #tpu.dimension_semantics<arbitrary>], iteration_bounds = array<i64: 1, 1, 1>, scalar_prefetch = 0 : i64, scratch_operands = 1 : i64, tpu.core_type = #tpu.core_type<tc>, window_params = [{transform_indices = @transform_0, window_bounds = array<i64: 16, 128>}, {transform_indices = @transform_1, window_bounds = array<i64: 128, 128>}, {transform_indices = @transform_2, window_bounds = array<i64: 1, 128>}, {transform_indices = @transform_3, window_bounds = array<i64: 16, 128>}]} {
    %c0_i32 = arith.constant 0 : i32
    %0 = arith.cmpi eq, %arg2, %c0_i32 : i32
    %1 = arith.extui %0 : i1 to i32
    %c0_i32_0 = arith.constant 0 : i32
    %2 = arith.cmpi ne, %1, %c0_i32_0 : i32
    scf.if %2 {
      %cst_10 = arith.constant 0.000000e+00 : f32
      %12 = vector.broadcast %cst_10 : f32 to vector<16x128xf32>
      %c0_11 = arith.constant 0 : index
      %c0_12 = arith.constant 0 : index
      %13 = vector.load %arg7[%c0_11, %c0_12] : memref<16x128xf32, #tpu.memory_space<vmem>>, vector<16x128xf32>
      tpu.vector_store %arg7[%c0_11, %c0_12], %12 {strides = array<i32>} : memref<16x128xf32, #tpu.memory_space<vmem>>, vector<16x128xf32>,
    } else {
    }
    %c0 = arith.constant 0 : index
    %c0_1 = arith.constant 0 : index
    %3 = vector.load %arg7[%c0, %c0_1] : memref<16x128xf32, #tpu.memory_space<vmem>>, vector<16x128xf32>
    %c0_2 = arith.constant 0 : index
    %c0_3 = arith.constant 0 : index
    %4 = vector.load %arg3[%c0_2, %c0_3] : memref<16x128xf32, #tpu.memory_space<vmem>>, vector<16x128xf32>
    %c0_4 = arith.constant 0 : index
    %c0_5 = arith.constant 0 : index
    %5 = vector.load %arg4[%c0_4, %c0_5] : memref<128x128xf32, #tpu.memory_space<vmem>>, vector<128x128xf32>
    %cst = arith.constant dense<0.000000e+00> : vector<16x128xf32>
    %6 = tpu.matmul %4, %5, %cst {dimension_numbers = #tpu.dot_dimension_numbers<[1], [0], [0], [1], [0, 0, 1, 1], [], []>} : vector<16x128xf32>, vector<128x128xf32>, vector<16x128xf32> -> vector<16x128xf32>
    %7 = arith.addf %3, %6 : vector<16x128xf32>
    %c0_6 = arith.constant 0 : index
    %c0_7 = arith.constant 0 : index
    %8 = vector.load %arg7[%c0_6, %c0_7] : memref<16x128xf32, #tpu.memory_space<vmem>>, vector<16x128xf32>
    tpu.vector_store %arg7[%c0_6, %c0_7], %7 {strides = array<i32>} : memref<16x128xf32, #tpu.memory_space<vmem>>, vector<16x128xf32>,
    %c0_i32_8 = arith.constant 0 : i32
    %9 = arith.cmpi eq, %arg2, %c0_i32_8 : i32
    %10 = arith.extui %9 : i1 to i32
    %c0_i32_9 = arith.constant 0 : i32
    %11 = arith.cmpi ne, %10, %c0_i32_9 : i32
    scf.if %11 {
      %c0_10 = arith.constant 0 : index
      %c0_11 = arith.constant 0 : index
      %12 = vector.load %arg7[%c0_10, %c0_11] : memref<16x128xf32, #tpu.memory_space<vmem>>, vector<16x128xf32>
      %c0_12 = arith.constant 0 : index
      %c0_13 = arith.constant 0 : index
      %13 = vector.load %arg5[%c0_12, %c0_13] : memref<1x128xf32, #tpu.memory_space<vmem>>, vector<1x128xf32>
      %14 = vector.broadcast %13 : vector<1x128xf32> to vector<16x128xf32>
      %15 = arith.addf %12, %14 : vector<16x128xf32>
      %c0_14 = arith.constant 0 : index
      %c0_15 = arith.constant 0 : index
      %16 = vector.load %arg6[%c0_14, %c0_15] : memref<16x128xf32, #tpu.memory_space<vmem>>, vector<16x128xf32>
      tpu.vector_store %arg6[%c0_14, %c0_15], %15 {strides = array<i32>} : memref<16x128xf32, #tpu.memory_space<vmem>>, vector<16x128xf32>,
    } else {
    }
    return
  }
  func.func @transform_0(%arg0: i32, %arg1: i32, %arg2: i32) -> (i32, i32) {
    %c0_i32 = arith.constant 0 : i32
    return %arg0, %arg2 : i32, i32
  }
  func.func @transform_1(%arg0: i32, %arg1: i32, %arg2: i32) -> (i32, i32) {
    %c0_i32 = arith.constant 0 : i32
    return %arg2, %arg1 : i32, i32
  }
  func.func @transform_2(%arg0: i32, %arg1: i32, %arg2: i32) -> (i32, i32) {
    %c0_i32 = arith.constant 0 : i32
    %c0_i32_0 = arith.constant 0 : i32
    return %c0_i32, %arg1 : i32, i32
  }
  func.func @transform_3(%arg0: i32, %arg1: i32, %arg2: i32) -> (i32, i32) {
    %c0_i32 = arith.constant 0 : i32
    return %arg0, %arg1 : i32, i32
  }
}

</mosaic_0001>

<bundles_post_ra>
// kernel: tpu_custom_call.1
= control target key start
LH: loop header
LB: loop body
LE: loop exit
PB: predicated region body
PF: predicated region fallthrough
CT: control target
= control target key end

     0   :  { %8 = vsyncpa [#allocation4], 0  ;;  %s353_s0 = inlined_call_operand.hbm [shape: f32[16,128], index: 0, kind: input, shape index: {}]   ;;  %s354_s1 = inlined_call_operand.hbm [shape: f32[128,128], index: 1, kind: input, shape index: {}]   ;;  %s355_s2 = inlined_call_operand.vmem [shape: f32[1,128], index: 2, kind: input, shape index: {}]   ;;  %s356_s3 = inlined_call_operand.hbm [shape: f32[16,128], index: 3, kind: output, shape index: {}]  }
   0x1   :  { %9 = vsyncpa [#allocation7], 0 }
   0x2   :  { %10 = vsyncpa [#allocation5], 0  ;;  %s307_s12 = smov [#allocation3]  }
   0x3   :  { %s16_s13 = sshll.u32 %s307_s12, 4  ;;  %s17_s13 = int_to_ptr.vmem [resolvable:$true] %s16_s13 }
   0x4   :  { %s249_s14 = scalar_lea.vmem %s17_s13, 256  ;;  %p254_p1 = scmp.lt.s32.totalorder %s17_s13, %s17_s13 }
   0x5   :  { %p250_p0 = scmp.ne.s32.totalorder %s17_s13, %s249_s14  ;;  %p255_p2 = scmp.lt.s32.totalorder %s249_s14, %s249_s14 }
   0x7   :  { %p256_p3 = por %p255_p2, %p254_p1 }
   0x9   :  { %p257_p4 = pnand %p256_p3, %p250_p0 }
   0xb   :  { %260 = shalt.err (!%p257_p4)
}
   0xc   :  { %s308_s15 = smov 128   ;;  %s309_s16 = smov 8  }
   0xd   :  { %22 = dma.hbm_to_vmem [thread:$0]  %s353_s0, 256, %s17_s13, [#allocation4], %s308_s15, %s308_s15, %s309_s16  }
   0xe   :  { %s310_s19 = smov [#allocation6]  }
   0xf   :  { %s28_s20 = sshll.u32 %s310_s19, 4  ;;  %s29_s20 = int_to_ptr.vmem [resolvable:$true] %s28_s20 }
  0x10   :  { %s269_s21 = scalar_lea.vmem %s29_s20, 2048  ;;  %p274_p6 = scmp.lt.s32.totalorder %s29_s20, %s29_s20 }
  0x11   :  { %p270_p5 = scmp.ne.s32.totalorder %s29_s20, %s269_s21  ;;  %p275_p7 = scmp.lt.s32.totalorder %s269_s21, %s269_s21 }
  0x13   :  { %p276_p8 = por %p275_p7, %p274_p6 }
  0x15   :  { %p277_p9 = pnand %p276_p8, %p270_p5 }
  0x17   :  { %280 = shalt.err (!%p277_p9)
}
  0x18   :  { %34 = dma.hbm_to_vmem [thread:$0]  %s354_s1, 2048, %s29_s20, [#allocation7], %s308_s15, %s308_s15, %s309_s16  }
  0x19   :  { %301 = dma.done.wait [#allocation4], 256  }
  0x1a   :  { %302 = vsyncadd [#allocation4], 4294967040 }
  0x1b   :  { %303 = dma.done.wait [#allocation7], 2048  }
  0x1c   :  { %304 = vsyncadd [#allocation7], 4294965248  ;;  %v68_v0 = vld [vmem:[#allocation6 + $0x78] sm:$0xff]  ;;  %v67_v1 = vld [vmem:[#allocation6 + $0x70] sm:$0xff]  ;;  %s311_s24 = smov [#allocation8]  }
  0x1d   :  { %201 = vmatprep.subr.mxu0 %v68_v0  ;;  %v66_v2 = vld [vmem:[#allocation6 + $0x68] sm:$0xff]  ;;  %v65_v3 = vld [vmem:[#allocation6 + $0x60] sm:$0xff]  ;;  %v51_v4 = vld [vmem:[#allocation3] sm:$0xff]  ;;  %s169_s25 = sshll.u32 %s311_s24, 4  ;;  %s170_s25 = int_to_ptr.vmem [resolvable:$true] %s169_s25 }
  0x1e   :  { %202 = vmatpush3.msra.mxu0 %v68_v0  ;;  %v64_v5 = vld [vmem:[#allocation6 + $0x58] sm:$0xff]  ;;  %233 = vmatprep.mubr.f32.mxu0 %v51_v4  ;;  %v63_v6 = vld [vmem:[#allocation6 + $0x50] sm:$0xff]  ;;  %v62_v7 = vld [vmem:[#allocation6 + $0x48] sm:$0xff]  ;;  %s281_s26 = scalar_lea.vmem %s170_s25, 256  ;;  %p286_p11 = scmp.lt.s32.totalorder %s170_s25, %s170_s25 }
  0x1f   :  { %203 = vmatprep.subr.mxu0 %v67_v1  ;;  %v61_v8 = vld [vmem:[#allocation6 + $0x40] sm:$0xff]  ;;  %v60_v9 = vld [vmem:[#allocation6 + $0x38] sm:$0xff]  ;;  %v59_v10 = vld [vmem:[#allocation6 + $0x30] sm:$0xff]  ;;  %p282_p10 = scmp.ne.s32.totalorder %s170_s25, %s281_s26  ;;  %p287_p12 = scmp.lt.s32.totalorder %s281_s26, %s281_s26 }
  0x20   :  { %204 = vmatpush3.msra.mxu0 %v67_v1  ;;  %v58_v11 = vld [vmem:[#allocation6 + $0x28] sm:$0xff]  ;;  %v57_v12 = vld [vmem:[#allocation6 + $0x20] sm:$0xff]  ;;  %v56_v13 = vld [vmem:[#allocation6 + $0x18] sm:$0xff] }
  0x21   :  { %205 = vmatprep.subr.mxu0 %v66_v2  ;;  %v55_v14 = vld [vmem:[#allocation6 + $0x10] sm:$0xff]  ;;  %v54_v15 = vld [vmem:[#allocation6 + $0x8] sm:$0xff]  ;;  %v53_v16 = vld [vmem:[#allocation6] sm:$0xff]  ;;  %p288_p13 = por %p287_p12, %p286_p11 }
  0x22   :  { %206 = vmatpush3.msra.mxu0 %v66_v2  ;;  %v52_v17 = vld [vmem:[#allocation3 + $0x8] sm:$0xff]  ;;  %v182_v18 = vld [vmem:[%s355_s2] ss:$0 sm:$0xff] }
  0x23   :  { %207 = vmatprep.subr.mxu0 %v65_v3  ;;  %p289_p0 = pnand %p288_p13, %p282_p10 }
  0x24   :  { %208 = vmatpush3.msra.mxu0 %v65_v3 }
  0x25   :  { %209 = vmatprep.subr.mxu0 %v64_v5 }
  0x26   :  { %210 = vmatpush3.msra.mxu0 %v64_v5 }
  0x27   :  { %211 = vmatprep.subr.mxu0 %v63_v6 }
  0x28   :  { %212 = vmatpush3.msra.mxu0 %v63_v6 }
  0x29   :  { %213 = vmatprep.subr.mxu0 %v62_v7 }
  0x2a   :  { %214 = vmatpush3.msra.mxu0 %v62_v7 }
  0x2b   :  { %215 = vmatprep.subr.mxu0 %v61_v8 }
  0x2c   :  { %216 = vmatpush3.msra.mxu0 %v61_v8 }
  0x2d   :  { %217 = vmatprep.subr.mxu0 %v60_v9 }
  0x2e   :  { %218 = vmatpush3.msra.mxu0 %v60_v9 }
  0x2f   :  { %219 = vmatprep.subr.mxu0 %v59_v10 }
  0x30   :  { %220 = vmatpush3.msra.mxu0 %v59_v10 }
  0x31   :  { %221 = vmatprep.subr.mxu0 %v58_v11 }
  0x32   :  { %222 = vmatpush3.msra.mxu0 %v58_v11 }
  0x33   :  { %223 = vmatprep.subr.mxu0 %v57_v12 }
  0x34   :  { %224 = vmatpush3.msra.mxu0 %v57_v12 }
  0x35   :  { %225 = vmatprep.subr.mxu0 %v56_v13 }
  0x36   :  { %226 = vmatpush3.msra.mxu0 %v56_v13 }
  0x37   :  { %227 = vmatprep.subr.mxu0 %v55_v14 }
  0x38   :  { %228 = vmatpush3.msra.mxu0 %v55_v14 }
  0x39   :  { %229 = vmatprep.subr.mxu0 %v54_v15 }
  0x3a   :  { %230 = vmatpush3.msra.mxu0 %v54_v15 }
  0x3b   :  { %231 = vmatprep.subr.mxu0 %v53_v16 }
  0x3c   :  { %232 = vmatpush3.msra.mxu0 %v53_v16 }
  0x3d   :  { %234 = vmatmul.mubr.f32.vlgmr.msra.gmra.mxu0 %v52_v17 }
  0xfd   :  { %v235_v19 = vpop.f32.mrf.mxu0 }
  0xfe   :  { %v161_v20 = vadd.f32 %v235_v19, %v182_v18 }
  0xff   :  { %v135_v21 = vpop.f32.mrf.mxu0 }
 0x100   :  { %163 = vst [vmem:[#allocation8 + $0x8] sm:$0xff] %v161_v20  ;;  %v160_v22 = vadd.f32 %v182_v18, %v135_v21 }
 0x102   :  { %162 = vst [vmem:[#allocation8] sm:$0xff] %v160_v22 }
 0x103   :  { %292 = shalt.err (!%p289_p0)
}
 0x104   :  { %175 = dma.vmem_to_hbm [thread:$0]  %s170_s25, 256, %s356_s3, [#allocation5], %s308_s15, %s308_s15, %s309_s16  }
 0x105   :  { %305 = dma.done.wait [#allocation5], 256  }
 0x106   :  { %306 = vsyncadd [#allocation5], 4294967040 }
 0x107   :  { %179 = vsyncpa [#allocation4], 1 }
 0x108   :  { %180 = vsyncpa [#allocation7], 1 }
 0x109   :  { %181 = vsyncpa [#allocation5], 1 }

</bundles_post_ra>
